<compile_context>
chip_gen: v5e
topology: v5e:2x2
jax: 0.10.0
libtpu: 0.0.40
codegen_flags: <defaults>
</compile_context>

<pallas_src>
import math
import functools
import numpy as np
import jax
import jax.numpy as jnp
from jax import lax
from jax.experimental import pallas as pl
from jax.experimental.pallas import tpu as pltpu

# ---------------- MlaConfig (small, synthetic) ----------------
B       = 2    # batch
H       = 2    # num heads
S_Q     = 8    # query length
S_KV    = 8    # key/value length
D_MODEL = 32   # model dim
D_NOPE  = 16   # per-head non-rope q/k dim
D_ROPE  = 8    # per-head rope dim
D_C     = 16   # compressed KV (latent) dim
D_V     = 16   # per-head value dim
SCALE   = 1.0 / math.sqrt(D_NOPE + D_ROPE)
_HALF   = D_ROPE // 2
_NEG_INF = -1e9


# ---------------------- Pallas kernel --------------------------
def _mla_kernel(q_ref, kv_ref, wqn_ref, wqr_ref, wkvc_ref, wkvr_ref,
                wuk_ref, wuv_ref, cosq_ref, sinq_ref, cosk_ref, sink_ref,
                *rest, q_position, have_causal_mask, has_user_mask):
    if has_user_mask:
        mask_ref, out_ref = rest
    else:
        (out_ref,) = rest

    bf16 = jnp.bfloat16
    q  = q_ref[0]          # (S_Q, D_MODEL)  bf16
    kv = kv_ref[0]         # (S_KV, D_MODEL) bf16
    sq_len, skv = q.shape[0], kv.shape[0]

    # -------- head-invariant work: computed once per batch program --------
    # kv down-projection (pre-split weights -> lane-aligned result tiles)
    c_kv   = jnp.dot(kv, wkvc_ref[...], preferred_element_type=jnp.float32)  # (S_KV, D_C)
    k_rope = jnp.dot(kv, wkvr_ref[...], preferred_element_type=jnp.float32)  # (S_KV, D_ROPE)

    # RoPE(k): split-half form (no concat of negated slices), f32 elementwise
    ck, sk = cosk_ref[...], sink_ref[...]          # (S_KV, D_ROPE//2)
    k1, k2 = k_rope[:, :_HALF], k_rope[:, _HALF:]
    k_r1_t = (k1 * ck - k2 * sk).T.astype(bf16)    # (half, S_KV) hoisted transpose
    k_r2_t = (k2 * ck + k1 * sk).T.astype(bf16)

    c_kv_bf = c_kv.astype(bf16)                    # MXU operand (probs @ c_kv)
    c_kv_t  = c_kv.T.astype(bf16)                  # hoisted transpose, shared by heads

    cq, sq_tab = cosq_ref[...], sinq_ref[...]      # (S_Q, D_ROPE//2)

    # additive bias shared by all heads; causal part generated in-kernel
    bias = jnp.zeros((sq_len, skv), jnp.float32)
    if has_user_mask:
        bias = bias + mask_ref[0]
    if have_causal_mask:
        qpos = q_position + lax.broadcasted_iota(jnp.int32, (sq_len, skv), 0)
        kpos = lax.broadcasted_iota(jnp.int32, (sq_len, skv), 1)
        bias = bias + jnp.where(kpos <= qpos, 0.0, _NEG_INF)

    # -------- per-head path (static unroll: all heads in one program) -----
    outs = []
    for h in range(H):
        # q projection (nope / rope weights pre-split)
        q_nope = jnp.dot(q, wqn_ref[h], preferred_element_type=jnp.float32)  # (S_Q, D_NOPE)
        q_rope = jnp.dot(q, wqr_ref[h], preferred_element_type=jnp.float32)  # (S_Q, D_ROPE)

        # RoPE(q), split-half form
        q1, q2 = q_rope[:, :_HALF], q_rope[:, _HALF:]
        q_r1 = (q1 * cq - q2 * sq_tab).astype(bf16)
        q_r2 = (q2 * cq + q1 * sq_tab).astype(bf16)
        rope_scores = (jnp.dot(q_r1, k_r1_t, preferred_element_type=jnp.float32) +
                       jnp.dot(q_r2, k_r2_t, preferred_element_type=jnp.float32))

        # absorb K up-projection into the query, score against compressed KV
        q_abs = jnp.dot(q_nope.astype(bf16), wuk_ref[h],
                        preferred_element_type=jnp.float32)                  # (S_Q, D_C)
        nope_scores = jnp.dot(q_abs.astype(bf16), c_kv_t,
                              preferred_element_type=jnp.float32)            # (S_Q, S_KV)

        # scale, mask, softmax (f32), EUP reciprocal for the normalization
        scores = (nope_scores + rope_scores) * SCALE + bias
        m = jnp.max(scores, axis=-1, keepdims=True)
        e = jnp.exp(scores - m)
        probs = e * pl.reciprocal(jnp.sum(e, axis=-1, keepdims=True), approx=True)

        latent = jnp.dot(probs.astype(bf16), c_kv_bf,
                         preferred_element_type=jnp.float32)                 # (S_Q, D_C)
        outs.append(jnp.dot(latent.astype(bf16), wuv_ref[h],
                            preferred_element_type=jnp.float32))             # (S_Q, D_V)

    # lane-dense single store: heads folded into the last (lane) dim
    out_ref[0] = jnp.concatenate(outs, axis=-1)                              # (S_Q, H*D_V)


# ------------------------- wrapper -----------------------------
def _rope_tables(positions, d_rope):
    # half-width tables; cos/sin are duplicated across halves in standard RoPE
    half = d_rope // 2
    inv_freq = 1.0 / (10000.0 ** (jnp.arange(half, dtype=jnp.float32) / half))
    ang = positions.astype(jnp.float32)[:, None] * inv_freq[None, :]   # (S, half)
    return jnp.cos(ang), jnp.sin(ang)


def mla_attention(q, kv, params, *, mask=None, q_position=0, have_causal_mask=False):
    if q_position is None:
        q_position = 0
    b, sq_len, _ = q.shape
    _, skv, _ = kv.shape
    bf16 = jnp.bfloat16

    # pre-split weights (nope/rope, latent/rope); bf16 MXU operands, f32 accum
    Wq, Wkvd = params["Wq"], params["Wkvd"]
    wq_nope = Wq[..., :D_NOPE].astype(bf16)      # (H, D_MODEL, D_NOPE)
    wq_rope = Wq[..., D_NOPE:].astype(bf16)      # (H, D_MODEL, D_ROPE)
    wkv_c   = Wkvd[:, :D_C].astype(bf16)         # (D_MODEL, D_C)
    wkv_r   = Wkvd[:, D_C:].astype(bf16)         # (D_MODEL, D_ROPE)
    wuk     = params["Wuk"].astype(bf16)         # (H, D_NOPE, D_C)
    wuv     = params["Wuv"].astype(bf16)         # (H, D_C, D_V)
    q_bf, kv_bf = q.astype(bf16), kv.astype(bf16)

    cos_q, sin_q = _rope_tables(q_position + jnp.arange(sq_len), D_ROPE)
    cos_k, sin_k = _rope_tables(jnp.arange(skv), D_ROPE)

    has_user_mask = mask is not None
    kernel = functools.partial(
        _mla_kernel,
        q_position=int(q_position),
        have_causal_mask=bool(have_causal_mask),
        has_user_mask=has_user_mask)

    in_specs = [
        pl.BlockSpec((1, sq_len, D_MODEL),  lambda bi: (bi, 0, 0)),   # q
        pl.BlockSpec((1, skv, D_MODEL),     lambda bi: (bi, 0, 0)),   # kv
        pl.BlockSpec((H, D_MODEL, D_NOPE),  lambda bi: (0, 0, 0)),    # Wq_nope
        pl.BlockSpec((H, D_MODEL, D_ROPE),  lambda bi: (0, 0, 0)),    # Wq_rope
        pl.BlockSpec((D_MODEL, D_C),        lambda bi: (0, 0)),       # Wkv_c
        pl.BlockSpec((D_MODEL, D_ROPE),     lambda bi: (0, 0)),       # Wkv_rope
        pl.BlockSpec((H, D_NOPE, D_C),      lambda bi: (0, 0, 0)),    # Wuk
        pl.BlockSpec((H, D_C, D_V),         lambda bi: (0, 0, 0)),    # Wuv
        pl.BlockSpec((sq_len, _HALF),       lambda bi: (0, 0)),       # cos_q
        pl.BlockSpec((sq_len, _HALF),       lambda bi: (0, 0)),       # sin_q
        pl.BlockSpec((skv, _HALF),          lambda bi: (0, 0)),       # cos_k
        pl.BlockSpec((skv, _HALF),          lambda bi: (0, 0)),       # sin_k
    ]
    args = [q_bf, kv_bf, wq_nope, wq_rope, wkv_c, wkv_r, wuk, wuv,
            cos_q, sin_q, cos_k, sin_k]
    if has_user_mask:
        in_specs.append(pl.BlockSpec((1, sq_len, skv), lambda bi: (bi, 0, 0)))
        args.append(mask.astype(jnp.float32))

    out = pl.pallas_call(
        kernel,
        out_shape=jax.ShapeDtypeStruct((b, sq_len, H * D_V), jnp.float32),
        grid=(b,),
        in_specs=in_specs,
        out_specs=pl.BlockSpec((1, sq_len, H * D_V), lambda bi: (bi, 0, 0)),
        compiler_params=pltpu.CompilerParams(
            dimension_semantics=("parallel",)),
    )(*args)

    # lane-dense kernel output (B, S_Q, H*D_V) -> module layout (B, H, S_Q, D_V)
    return out.reshape(b, sq_len, H, D_V).transpose(0, 2, 1, 3)


# ---------------------- pure-JAX reference ---------------------
def mla_reference(q, kv, params, *, mask=None, q_position=0, have_causal_mask=False):
    if q_position is None:
        q_position = 0
    Wq, Wkvd, Wuk, Wuv = params["Wq"], params["Wkvd"], params["Wuk"], params["Wuv"]
    hi = jax.lax.Precision.HIGHEST
    qh = jnp.einsum("bsd,hde->bhse", q, Wq, precision=hi)
    q_nope, q_rope = qh[..., :D_NOPE], qh[..., D_NOPE:]
    ckv = jnp.einsum("bsd,de->bse", kv, Wkvd, precision=hi)
    c_kv, k_rope = ckv[..., :D_C], ckv[..., D_C:]

    cq_h, sq_h = _rope_tables(q_position + jnp.arange(q.shape[1]), D_ROPE)
    ck_h, sk_h = _rope_tables(jnp.arange(kv.shape[1]), D_ROPE)
    cos_q = jnp.concatenate([cq_h, cq_h], -1); sin_q = jnp.concatenate([sq_h, sq_h], -1)
    cos_k = jnp.concatenate([ck_h, ck_h], -1); sin_k = jnp.concatenate([sk_h, sk_h], -1)

    def rot_half(x):
        h = x.shape[-1] // 2
        return jnp.concatenate([-x[..., h:], x[..., :h]], axis=-1)

    q_rope_r = q_rope * cos_q + rot_half(q_rope) * sin_q
    k_rope_r = k_rope * cos_k + rot_half(k_rope) * sin_k
    rope_scores = jnp.einsum("bhqr,bkr->bhqk", q_rope_r, k_rope_r, precision=hi)

    q_abs = jnp.einsum("bhqn,hnc->bhqc", q_nope, Wuk, precision=hi)
    nope_scores = jnp.einsum("bhqc,bkc->bhqk", q_abs, c_kv, precision=hi)

    scores = (nope_scores + rope_scores) * SCALE
    if mask is not None:
        scores = scores + mask[:, None]
    if have_causal_mask:
        qpos = q_position + jnp.arange(q.shape[1])[:, None]
        kpos = jnp.arange(kv.shape[1])[None, :]
        scores = scores + jnp.where(kpos <= qpos, 0.0, _NEG_INF)[None, None]
    probs = jax.nn.softmax(scores, axis=-1)
    latent = jnp.einsum("bhqk,bkc->bhqc", probs, c_kv, precision=hi)
    return jnp.einsum("bhqc,hcv->bhqv", latent, Wuv, precision=hi)


# --------------------------- main -------------------------------
if __name__ == "__main__":
    key = jax.random.PRNGKey(0)
    k_q, k_kv, k1, k2, k3, k4 = jax.random.split(key, 6)

    q = jax.random.normal(k_q, (B, S_Q, D_MODEL), jnp.float32)
    kv = jax.random.normal(k_kv, (B, S_KV, D_MODEL), jnp.float32)

    params = {
        "Wq":   0.05 * jax.random.normal(k1, (H, D_MODEL, D_NOPE + D_ROPE), jnp.float32),
        "Wkvd": 0.05 * jax.random.normal(k2, (D_MODEL, D_C + D_ROPE), jnp.float32),
        "Wuk":  0.05 * jax.random.normal(k3, (H, D_NOPE, D_C), jnp.float32),
        "Wuv":  0.05 * jax.random.normal(k4, (H, D_C, D_V), jnp.float32),
    }

    out = mla_attention(q, kv, params, mask=None, q_position=0, have_causal_mask=True)
    out = jax.block_until_ready(out)

    ref = mla_reference(q, kv, params, mask=None, q_position=0, have_causal_mask=True)
    ref = jax.block_until_ready(ref)

    np.testing.assert_allclose(np.asarray(out), np.asarray(ref), atol=1e-2, rtol=1e-2)
    print("KERNEL_OK")
</pallas_src>

<mosaic_0001>
module attributes {stable_mosaic.version = 11 : i64} {
  func.func @_mla_kernel(%arg0: i32, %arg1: memref<1x8x32xbf16, #tpu.memory_space<vmem>>, %arg2: memref<1x8x32xbf16, #tpu.memory_space<vmem>>, %arg3: memref<2x32x16xbf16, #tpu.memory_space<vmem>>, %arg4: memref<2x32x8xbf16, #tpu.memory_space<vmem>>, %arg5: memref<32x16xbf16, #tpu.memory_space<vmem>>, %arg6: memref<32x8xbf16, #tpu.memory_space<vmem>>, %arg7: memref<2x16x16xbf16, #tpu.memory_space<vmem>>, %arg8: memref<2x16x16xbf16, #tpu.memory_space<vmem>>, %arg9: memref<8x4xf32, #tpu.memory_space<vmem>>, %arg10: memref<8x4xf32, #tpu.memory_space<vmem>>, %arg11: memref<8x4xf32, #tpu.memory_space<vmem>>, %arg12: memref<8x4xf32, #tpu.memory_space<vmem>>, %arg13: memref<1x8x32xf32, #tpu.memory_space<vmem>>) attributes {dimension_semantics = [#tpu.dimension_semantics<parallel>], iteration_bounds = array<i64: 2>, scalar_prefetch = 0 : i64, scratch_operands = 0 : i64, tpu.core_type = #tpu.core_type<tc>, window_params = [{transform_indices = @transform_0, window_bounds = array<i64: 1, 8, 32>}, {transform_indices = @transform_1, window_bounds = array<i64: 1, 8, 32>}, {pipeline_mode = #tpu.pipeline_mode<synchronous>, transform_indices = @transform_2, window_bounds = array<i64: 2, 32, 16>}, {pipeline_mode = #tpu.pipeline_mode<synchronous>, transform_indices = @transform_3, window_bounds = array<i64: 2, 32, 8>}, {pipeline_mode = #tpu.pipeline_mode<synchronous>, transform_indices = @transform_4, window_bounds = array<i64: 32, 16>}, {pipeline_mode = #tpu.pipeline_mode<synchronous>, transform_indices = @transform_5, window_bounds = array<i64: 32, 8>}, {pipeline_mode = #tpu.pipeline_mode<synchronous>, transform_indices = @transform_6, window_bounds = array<i64: 2, 16, 16>}, {pipeline_mode = #tpu.pipeline_mode<synchronous>, transform_indices = @transform_7, window_bounds = array<i64: 2, 16, 16>}, {pipeline_mode = #tpu.pipeline_mode<synchronous>, transform_indices = @transform_8, window_bounds = array<i64: 8, 4>}, {pipeline_mode = #tpu.pipeline_mode<synchronous>, transform_indices = @transform_9, window_bounds = array<i64: 8, 4>}, {pipeline_mode = #tpu.pipeline_mode<synchronous>, transform_indices = @transform_10, window_bounds = array<i64: 8, 4>}, {pipeline_mode = #tpu.pipeline_mode<synchronous>, transform_indices = @transform_11, window_bounds = array<i64: 8, 4>}, {transform_indices = @transform_12, window_bounds = array<i64: 1, 8, 32>}]} {
    %c0 = arith.constant 0 : index
    %c0_0 = arith.constant 0 : index
    %c0_1 = arith.constant 0 : index
    %0 = vector.load %arg1[%c0, %c0_0, %c0_1] : memref<1x8x32xbf16, #tpu.memory_space<vmem>>, vector<1x8x32xbf16>
    %1 = vector.shape_cast %0 : vector<1x8x32xbf16> to vector<8x32xbf16>
    %c0_2 = arith.constant 0 : index
    %c0_3 = arith.constant 0 : index
    %c0_4 = arith.constant 0 : index
    %2 = vector.load %arg2[%c0_2, %c0_3, %c0_4] : memref<1x8x32xbf16, #tpu.memory_space<vmem>>, vector<1x8x32xbf16>
    %3 = vector.shape_cast %2 : vector<1x8x32xbf16> to vector<8x32xbf16>
    %c0_5 = arith.constant 0 : index
    %c0_6 = arith.constant 0 : index
    %4 = vector.load %arg5[%c0_5, %c0_6] : memref<32x16xbf16, #tpu.memory_space<vmem>>, vector<32x16xbf16>
    %cst = arith.constant dense<0.000000e+00> : vector<8x16xf32>
    %5 = tpu.matmul %3, %4, %cst {dimension_numbers = #tpu.dot_dimension_numbers<[1], [0], [0], [1], [0, 0, 1, 1], [], []>} : vector<8x32xbf16>, vector<32x16xbf16>, vector<8x16xf32> -> vector<8x16xf32>
    %c0_7 = arith.constant 0 : index
    %c0_8 = arith.constant 0 : index
    %6 = vector.load %arg6[%c0_7, %c0_8] : memref<32x8xbf16, #tpu.memory_space<vmem>>, vector<32x8xbf16>
    %cst_9 = arith.constant dense<0.000000e+00> : vector<8x8xf32>
    %7 = tpu.matmul %3, %6, %cst_9 {dimension_numbers = #tpu.dot_dimension_numbers<[1], [0], [0], [1], [0, 0, 1, 1], [], []>} : vector<8x32xbf16>, vector<32x8xbf16>, vector<8x8xf32> -> vector<8x8xf32>
    %c0_10 = arith.constant 0 : index
    %c0_11 = arith.constant 0 : index
    %8 = vector.load %arg11[%c0_10, %c0_11] : memref<8x4xf32, #tpu.memory_space<vmem>>, vector<8x4xf32>
    %c0_12 = arith.constant 0 : index
    %c0_13 = arith.constant 0 : index
    %9 = vector.load %arg12[%c0_12, %c0_13] : memref<8x4xf32, #tpu.memory_space<vmem>>, vector<8x4xf32>
    %10 = vector.extract_strided_slice %7 {offsets = [0, 0], sizes = [8, 4], strides = [1, 1]} : vector<8x8xf32> to vector<8x4xf32>
    %11 = vector.extract_strided_slice %7 {offsets = [0, 4], sizes = [8, 4], strides = [1, 1]} : vector<8x8xf32> to vector<8x4xf32>
    %12 = arith.mulf %10, %8 : vector<8x4xf32>
    %13 = arith.mulf %11, %9 : vector<8x4xf32>
    %14 = arith.subf %12, %13 : vector<8x4xf32>
    %15 = tpu.transpose %14, [1, 0] : vector<8x4xf32> -> vector<4x8xf32>
    %16 = arith.truncf %15 : vector<4x8xf32> to vector<4x8xbf16>
    %17 = arith.mulf %11, %8 : vector<8x4xf32>
    %18 = arith.mulf %10, %9 : vector<8x4xf32>
    %19 = arith.addf %17, %18 : vector<8x4xf32>
    %20 = tpu.transpose %19, [1, 0] : vector<8x4xf32> -> vector<4x8xf32>
    %21 = arith.truncf %20 : vector<4x8xf32> to vector<4x8xbf16>
    %22 = arith.truncf %5 : vector<8x16xf32> to vector<8x16xbf16>
    %23 = tpu.transpose %5, [1, 0] : vector<8x16xf32> -> vector<16x8xf32>
    %24 = arith.truncf %23 : vector<16x8xf32> to vector<16x8xbf16>
    %c0_14 = arith.constant 0 : index
    %c0_15 = arith.constant 0 : index
    %25 = vector.load %arg9[%c0_14, %c0_15] : memref<8x4xf32, #tpu.memory_space<vmem>>, vector<8x4xf32>
    %c0_16 = arith.constant 0 : index
    %c0_17 = arith.constant 0 : index
    %26 = vector.load %arg10[%c0_16, %c0_17] : memref<8x4xf32, #tpu.memory_space<vmem>>, vector<8x4xf32>
    %cst_18 = arith.constant 0.000000e+00 : f32
    %27 = vector.broadcast %cst_18 : f32 to vector<8x8xf32>
    %28 = tpu.iota {dimensions = array<i32: 0>} : vector<8x8xi32>
    %c0_i32 = arith.constant 0 : i32
    %29 = vector.broadcast %c0_i32 : i32 to vector<8x8xi32>
    %30 = arith.addi %29, %28 : vector<8x8xi32>
    %31 = tpu.iota {dimensions = array<i32: 1>} : vector<8x8xi32>
    %32 = arith.cmpi sle, %31, %30 : vector<8x8xi32>
    %cst_19 = arith.constant 0.000000e+00 : f32
    %cst_20 = arith.constant -1.000000e+09 : f32
    %33 = vector.broadcast %cst_19 : f32 to vector<8x8xf32>
    %34 = vector.broadcast %cst_20 : f32 to vector<8x8xf32>
    %35 = arith.select %32, %33, %34 : vector<8x8xi1>, vector<8x8xf32>
    %36 = arith.addf %27, %35 : vector<8x8xf32>
    %c0_21 = arith.constant 0 : index
    %c0_22 = arith.constant 0 : index
    %c0_23 = arith.constant 0 : index
    %37 = vector.load %arg3[%c0_21, %c0_22, %c0_23] : memref<2x32x16xbf16, #tpu.memory_space<vmem>>, vector<1x32x16xbf16>
    %38 = vector.shape_cast %37 : vector<1x32x16xbf16> to vector<32x16xbf16>
    %cst_24 = arith.constant dense<0.000000e+00> : vector<8x16xf32>
    %39 = tpu.matmul %1, %38, %cst_24 {dimension_numbers = #tpu.dot_dimension_numbers<[1], [0], [0], [1], [0, 0, 1, 1], [], []>} : vector<8x32xbf16>, vector<32x16xbf16>, vector<8x16xf32> -> vector<8x16xf32>
    %c0_25 = arith.constant 0 : index
    %c0_26 = arith.constant 0 : index
    %c0_27 = arith.constant 0 : index
    %40 = vector.load %arg4[%c0_25, %c0_26, %c0_27] : memref<2x32x8xbf16, #tpu.memory_space<vmem>>, vector<1x32x8xbf16>
    %41 = vector.shape_cast %40 : vector<1x32x8xbf16> to vector<32x8xbf16>
    %cst_28 = arith.constant dense<0.000000e+00> : vector<8x8xf32>
    %42 = tpu.matmul %1, %41, %cst_28 {dimension_numbers = #tpu.dot_dimension_numbers<[1], [0], [0], [1], [0, 0, 1, 1], [], []>} : vector<8x32xbf16>, vector<32x8xbf16>, vector<8x8xf32> -> vector<8x8xf32>
    %43 = vector.extract_strided_slice %42 {offsets = [0, 0], sizes = [8, 4], strides = [1, 1]} : vector<8x8xf32> to vector<8x4xf32>
    %44 = vector.extract_strided_slice %42 {offsets = [0, 4], sizes = [8, 4], strides = [1, 1]} : vector<8x8xf32> to vector<8x4xf32>
    %45 = arith.mulf %43, %25 : vector<8x4xf32>
    %46 = arith.mulf %44, %26 : vector<8x4xf32>
    %47 = arith.subf %45, %46 : vector<8x4xf32>
    %48 = arith.truncf %47 : vector<8x4xf32> to vector<8x4xbf16>
    %49 = arith.mulf %44, %25 : vector<8x4xf32>
    %50 = arith.mulf %43, %26 : vector<8x4xf32>
    %51 = arith.addf %49, %50 : vector<8x4xf32>
    %52 = arith.truncf %51 : vector<8x4xf32> to vector<8x4xbf16>
    %cst_29 = arith.constant dense<0.000000e+00> : vector<8x8xf32>
    %53 = tpu.matmul %48, %16, %cst_29 {dimension_numbers = #tpu.dot_dimension_numbers<[1], [0], [0], [1], [0, 0, 1, 1], [], []>} : vector<8x4xbf16>, vector<4x8xbf16>, vector<8x8xf32> -> vector<8x8xf32>
    %cst_30 = arith.constant dense<0.000000e+00> : vector<8x8xf32>
    %54 = tpu.matmul %52, %21, %cst_30 {dimension_numbers = #tpu.dot_dimension_numbers<[1], [0], [0], [1], [0, 0, 1, 1], [], []>} : vector<8x4xbf16>, vector<4x8xbf16>, vector<8x8xf32> -> vector<8x8xf32>
    %55 = arith.addf %53, %54 : vector<8x8xf32>
    %56 = arith.truncf %39 : vector<8x16xf32> to vector<8x16xbf16>
    %c0_31 = arith.constant 0 : index
    %c0_32 = arith.constant 0 : index
    %c0_33 = arith.constant 0 : index
    %57 = vector.load %arg7[%c0_31, %c0_32, %c0_33] : memref<2x16x16xbf16, #tpu.memory_space<vmem>>, vector<1x16x16xbf16>
    %58 = vector.shape_cast %57 : vector<1x16x16xbf16> to vector<16x16xbf16>
    %cst_34 = arith.constant dense<0.000000e+00> : vector<8x16xf32>
    %59 = tpu.matmul %56, %58, %cst_34 {dimension_numbers = #tpu.dot_dimension_numbers<[1], [0], [0], [1], [0, 0, 1, 1], [], []>} : vector<8x16xbf16>, vector<16x16xbf16>, vector<8x16xf32> -> vector<8x16xf32>
    %60 = arith.truncf %59 : vector<8x16xf32> to vector<8x16xbf16>
    %cst_35 = arith.constant dense<0.000000e+00> : vector<8x8xf32>
    %61 = tpu.matmul %60, %24, %cst_35 {dimension_numbers = #tpu.dot_dimension_numbers<[1], [0], [0], [1], [0, 0, 1, 1], [], []>} : vector<8x16xbf16>, vector<16x8xbf16>, vector<8x8xf32> -> vector<8x8xf32>
    %62 = arith.addf %61, %55 : vector<8x8xf32>
    %cst_36 = arith.constant 0.204124153 : f32
    %63 = vector.broadcast %cst_36 : f32 to vector<8x8xf32>
    %64 = arith.mulf %62, %63 : vector<8x8xf32>
    %65 = arith.addf %64, %36 : vector<8x8xf32>
    %cst_37 = arith.constant dense<0xFF800000> : vector<8xf32>
    %66 = vector.multi_reduction <maximumf>, %65, %cst_37 [1] : vector<8x8xf32> to vector<8xf32>
    %67 = vector.shape_cast %66 : vector<8xf32> to vector<8x1xf32>
    %68 = vector.broadcast %67 : vector<8x1xf32> to vector<8x8xf32>
    %69 = arith.subf %65, %68 : vector<8x8xf32>
    %70 = math.exp %69 : vector<8x8xf32>
    %cst_38 = arith.constant dense<0.000000e+00> : vector<8xf32>
    %71 = vector.multi_reduction <add>, %70, %cst_38 [1] : vector<8x8xf32> to vector<8xf32>
    %72 = vector.shape_cast %71 : vector<8xf32> to vector<8x1xf32>
    %73 = tpu.reciprocal %72 {approx = true} : vector<8x1xf32> -> vector<8x1xf32>
    %74 = vector.broadcast %73 : vector<8x1xf32> to vector<8x8xf32>
    %75 = arith.mulf %70, %74 : vector<8x8xf32>
    %76 = arith.truncf %75 : vector<8x8xf32> to vector<8x8xbf16>
    %cst_39 = arith.constant dense<0.000000e+00> : vector<8x16xf32>
    %77 = tpu.matmul %76, %22, %cst_39 {dimension_numbers = #tpu.dot_dimension_numbers<[1], [0], [0], [1], [0, 0, 1, 1], [], []>} : vector<8x8xbf16>, vector<8x16xbf16>, vector<8x16xf32> -> vector<8x16xf32>
    %78 = arith.truncf %77 : vector<8x16xf32> to vector<8x16xbf16>
    %c0_40 = arith.constant 0 : index
    %c0_41 = arith.constant 0 : index
    %c0_42 = arith.constant 0 : index
    %79 = vector.load %arg8[%c0_40, %c0_41, %c0_42] : memref<2x16x16xbf16, #tpu.memory_space<vmem>>, vector<1x16x16xbf16>
    %80 = vector.shape_cast %79 : vector<1x16x16xbf16> to vector<16x16xbf16>
    %cst_43 = arith.constant dense<0.000000e+00> : vector<8x16xf32>
    %81 = tpu.matmul %78, %80, %cst_43 {dimension_numbers = #tpu.dot_dimension_numbers<[1], [0], [0], [1], [0, 0, 1, 1], [], []>} : vector<8x16xbf16>, vector<16x16xbf16>, vector<8x16xf32> -> vector<8x16xf32>
    %c1 = arith.constant 1 : index
    %c0_44 = arith.constant 0 : index
    %c0_45 = arith.constant 0 : index
    %82 = vector.load %arg3[%c1, %c0_44, %c0_45] : memref<2x32x16xbf16, #tpu.memory_space<vmem>>, vector<1x32x16xbf16>
    %83 = vector.shape_cast %82 : vector<1x32x16xbf16> to vector<32x16xbf16>
    %cst_46 = arith.constant dense<0.000000e+00> : vector<8x16xf32>
    %84 = tpu.matmul %1, %83, %cst_46 {dimension_numbers = #tpu.dot_dimension_numbers<[1], [0], [0], [1], [0, 0, 1, 1], [], []>} : vector<8x32xbf16>, vector<32x16xbf16>, vector<8x16xf32> -> vector<8x16xf32>
    %c1_47 = arith.constant 1 : index
    %c0_48 = arith.constant 0 : index
    %c0_49 = arith.constant 0 : index
    %85 = vector.load %arg4[%c1_47, %c0_48, %c0_49] : memref<2x32x8xbf16, #tpu.memory_space<vmem>>, vector<1x32x8xbf16>
    %86 = vector.shape_cast %85 : vector<1x32x8xbf16> to vector<32x8xbf16>
    %cst_50 = arith.constant dense<0.000000e+00> : vector<8x8xf32>
    %87 = tpu.matmul %1, %86, %cst_50 {dimension_numbers = #tpu.dot_dimension_numbers<[1], [0], [0], [1], [0, 0, 1, 1], [], []>} : vector<8x32xbf16>, vector<32x8xbf16>, vector<8x8xf32> -> vector<8x8xf32>
    %88 = vector.extract_strided_slice %87 {offsets = [0, 0], sizes = [8, 4], strides = [1, 1]} : vector<8x8xf32> to vector<8x4xf32>
    %89 = vector.extract_strided_slice %87 {offsets = [0, 4], sizes = [8, 4], strides = [1, 1]} : vector<8x8xf32> to vector<8x4xf32>
    %90 = arith.mulf %88, %25 : vector<8x4xf32>
    %91 = arith.mulf %89, %26 : vector<8x4xf32>
    %92 = arith.subf %90, %91 : vector<8x4xf32>
    %93 = arith.truncf %92 : vector<8x4xf32> to vector<8x4xbf16>
    %94 = arith.mulf %89, %25 : vector<8x4xf32>
    %95 = arith.mulf %88, %26 : vector<8x4xf32>
    %96 = arith.addf %94, %95 : vector<8x4xf32>
    %97 = arith.truncf %96 : vector<8x4xf32> to vector<8x4xbf16>
    %cst_51 = arith.constant dense<0.000000e+00> : vector<8x8xf32>
    %98 = tpu.matmul %93, %16, %cst_51 {dimension_numbers = #tpu.dot_dimension_numbers<[1], [0], [0], [1], [0, 0, 1, 1], [], []>} : vector<8x4xbf16>, vector<4x8xbf16>, vector<8x8xf32> -> vector<8x8xf32>
    %cst_52 = arith.constant dense<0.000000e+00> : vector<8x8xf32>
    %99 = tpu.matmul %97, %21, %cst_52 {dimension_numbers = #tpu.dot_dimension_numbers<[1], [0], [0], [1], [0, 0, 1, 1], [], []>} : vector<8x4xbf16>, vector<4x8xbf16>, vector<8x8xf32> -> vector<8x8xf32>
    %100 = arith.addf %98, %99 : vector<8x8xf32>
    %101 = arith.truncf %84 : vector<8x16xf32> to vector<8x16xbf16>
    %c1_53 = arith.constant 1 : index
    %c0_54 = arith.constant 0 : index
    %c0_55 = arith.constant 0 : index
    %102 = vector.load %arg7[%c1_53, %c0_54, %c0_55] : memref<2x16x16xbf16, #tpu.memory_space<vmem>>, vector<1x16x16xbf16>
    %103 = vector.shape_cast %102 : vector<1x16x16xbf16> to vector<16x16xbf16>
    %cst_56 = arith.constant dense<0.000000e+00> : vector<8x16xf32>
    %104 = tpu.matmul %101, %103, %cst_56 {dimension_numbers = #tpu.dot_dimension_numbers<[1], [0], [0], [1], [0, 0, 1, 1], [], []>} : vector<8x16xbf16>, vector<16x16xbf16>, vector<8x16xf32> -> vector<8x16xf32>
    %105 = arith.truncf %104 : vector<8x16xf32> to vector<8x16xbf16>
    %cst_57 = arith.constant dense<0.000000e+00> : vector<8x8xf32>
    %106 = tpu.matmul %105, %24, %cst_57 {dimension_numbers = #tpu.dot_dimension_numbers<[1], [0], [0], [1], [0, 0, 1, 1], [], []>} : vector<8x16xbf16>, vector<16x8xbf16>, vector<8x8xf32> -> vector<8x8xf32>
    %107 = arith.addf %106, %100 : vector<8x8xf32>
    %cst_58 = arith.constant 0.204124153 : f32
    %108 = vector.broadcast %cst_58 : f32 to vector<8x8xf32>
    %109 = arith.mulf %107, %108 : vector<8x8xf32>
    %110 = arith.addf %109, %36 : vector<8x8xf32>
    %cst_59 = arith.constant dense<0xFF800000> : vector<8xf32>
    %111 = vector.multi_reduction <maximumf>, %110, %cst_59 [1] : vector<8x8xf32> to vector<8xf32>
    %112 = vector.shape_cast %111 : vector<8xf32> to vector<8x1xf32>
    %113 = vector.broadcast %112 : vector<8x1xf32> to vector<8x8xf32>
    %114 = arith.subf %110, %113 : vector<8x8xf32>
    %115 = math.exp %114 : vector<8x8xf32>
    %cst_60 = arith.constant dense<0.000000e+00> : vector<8xf32>
    %116 = vector.multi_reduction <add>, %115, %cst_60 [1] : vector<8x8xf32> to vector<8xf32>
    %117 = vector.shape_cast %116 : vector<8xf32> to vector<8x1xf32>
    %118 = tpu.reciprocal %117 {approx = true} : vector<8x1xf32> -> vector<8x1xf32>
    %119 = vector.broadcast %118 : vector<8x1xf32> to vector<8x8xf32>
    %120 = arith.mulf %115, %119 : vector<8x8xf32>
    %121 = arith.truncf %120 : vector<8x8xf32> to vector<8x8xbf16>
    %cst_61 = arith.constant dense<0.000000e+00> : vector<8x16xf32>
    %122 = tpu.matmul %121, %22, %cst_61 {dimension_numbers = #tpu.dot_dimension_numbers<[1], [0], [0], [1], [0, 0, 1, 1], [], []>} : vector<8x8xbf16>, vector<8x16xbf16>, vector<8x16xf32> -> vector<8x16xf32>
    %123 = arith.truncf %122 : vector<8x16xf32> to vector<8x16xbf16>
    %c1_62 = arith.constant 1 : index
    %c0_63 = arith.constant 0 : index
    %c0_64 = arith.constant 0 : index
    %124 = vector.load %arg8[%c1_62, %c0_63, %c0_64] : memref<2x16x16xbf16, #tpu.memory_space<vmem>>, vector<1x16x16xbf16>
    %125 = vector.shape_cast %124 : vector<1x16x16xbf16> to vector<16x16xbf16>
    %cst_65 = arith.constant dense<0.000000e+00> : vector<8x16xf32>
    %126 = tpu.matmul %123, %125, %cst_65 {dimension_numbers = #tpu.dot_dimension_numbers<[1], [0], [0], [1], [0, 0, 1, 1], [], []>} : vector<8x16xbf16>, vector<16x16xbf16>, vector<8x16xf32> -> vector<8x16xf32>
    %127 = tpu.concatenate %81, %126 in 1 : vector<8x16xf32>, vector<8x16xf32> -> vector<8x32xf32>
    %c0_66 = arith.constant 0 : index
    %c0_67 = arith.constant 0 : index
    %c0_68 = arith.constant 0 : index
    %128 = vector.load %arg13[%c0_66, %c0_67, %c0_68] : memref<1x8x32xf32, #tpu.memory_space<vmem>>, vector<1x8x32xf32>
    %129 = vector.shape_cast %128 : vector<1x8x32xf32> to vector<8x32xf32>
    %130 = vector.shape_cast %127 : vector<8x32xf32> to vector<1x8x32xf32>
    tpu.vector_store %arg13[%c0_66, %c0_67, %c0_68], %130 {strides = array<i32>} : memref<1x8x32xf32, #tpu.memory_space<vmem>>, vector<1x8x32xf32>,
    return
  }
  func.func @transform_0(%arg0: i32) -> (i32, i32, i32) {
    %c0_i32 = arith.constant 0 : i32
    %c0_i32_0 = arith.constant 0 : i32
    %c0_i32_1 = arith.constant 0 : i32
    return %arg0, %c0_i32, %c0_i32_0 : i32, i32, i32
  }
  func.func @transform_1(%arg0: i32) -> (i32, i32, i32) {
    %c0_i32 = arith.constant 0 : i32
    %c0_i32_0 = arith.constant 0 : i32
    %c0_i32_1 = arith.constant 0 : i32
    return %arg0, %c0_i32, %c0_i32_0 : i32, i32, i32
  }
  func.func @transform_2(%arg0: i32) -> (i32, i32, i32) {
    %c0_i32 = arith.constant 0 : i32
    %c0_i32_0 = arith.constant 0 : i32
    %c0_i32_1 = arith.constant 0 : i32
    %c0_i32_2 = arith.constant 0 : i32
    return %c0_i32, %c0_i32_0, %c0_i32_1 : i32, i32, i32
  }
  func.func @transform_3(%arg0: i32) -> (i32, i32, i32) {
    %c0_i32 = arith.constant 0 : i32
    %c0_i32_0 = arith.constant 0 : i32
    %c0_i32_1 = arith.constant 0 : i32
    %c0_i32_2 = arith.constant 0 : i32
    return %c0_i32, %c0_i32_0, %c0_i32_1 : i32, i32, i32
  }
  func.func @transform_4(%arg0: i32) -> (i32, i32) {
    %c0_i32 = arith.constant 0 : i32
    %c0_i32_0 = arith.constant 0 : i32
    %c0_i32_1 = arith.constant 0 : i32
    return %c0_i32, %c0_i32_0 : i32, i32
  }
  func.func @transform_5(%arg0: i32) -> (i32, i32) {
    %c0_i32 = arith.constant 0 : i32
    %c0_i32_0 = arith.constant 0 : i32
    %c0_i32_1 = arith.constant 0 : i32
    return %c0_i32, %c0_i32_0 : i32, i32
  }
  func.func @transform_6(%arg0: i32) -> (i32, i32, i32) {
    %c0_i32 = arith.constant 0 : i32
    %c0_i32_0 = arith.constant 0 : i32
    %c0_i32_1 = arith.constant 0 : i32
    %c0_i32_2 = arith.constant 0 : i32
    return %c0_i32, %c0_i32_0, %c0_i32_1 : i32, i32, i32
  }
  func.func @transform_7(%arg0: i32) -> (i32, i32, i32) {
    %c0_i32 = arith.constant 0 : i32
    %c0_i32_0 = arith.constant 0 : i32
    %c0_i32_1 = arith.constant 0 : i32
    %c0_i32_2 = arith.constant 0 : i32
    return %c0_i32, %c0_i32_0, %c0_i32_1 : i32, i32, i32
  }
  func.func @transform_8(%arg0: i32) -> (i32, i32) {
    %c0_i32 = arith.constant 0 : i32
    %c0_i32_0 = arith.constant 0 : i32
    %c0_i32_1 = arith.constant 0 : i32
    return %c0_i32, %c0_i32_0 : i32, i32
  }
  func.func @transform_9(%arg0: i32) -> (i32, i32) {
    %c0_i32 = arith.constant 0 : i32
    %c0_i32_0 = arith.constant 0 : i32
    %c0_i32_1 = arith.constant 0 : i32
    return %c0_i32, %c0_i32_0 : i32, i32
  }
  func.func @transform_10(%arg0: i32) -> (i32, i32) {
    %c0_i32 = arith.constant 0 : i32
    %c0_i32_0 = arith.constant 0 : i32
    %c0_i32_1 = arith.constant 0 : i32
    return %c0_i32, %c0_i32_0 : i32, i32
  }
  func.func @transform_11(%arg0: i32) -> (i32, i32) {
    %c0_i32 = arith.constant 0 : i32
    %c0_i32_0 = arith.constant 0 : i32
    %c0_i32_1 = arith.constant 0 : i32
    return %c0_i32, %c0_i32_0 : i32, i32
  }
  func.func @transform_12(%arg0: i32) -> (i32, i32, i32) {
    %c0_i32 = arith.constant 0 : i32
    %c0_i32_0 = arith.constant 0 : i32
    %c0_i32_1 = arith.constant 0 : i32
    return %arg0, %c0_i32, %c0_i32_0 : i32, i32, i32
  }
}

</mosaic_0001>

<bundles_post_ra>
// kernel: tpu_custom_call.1
= control target key start
LH: loop header
LB: loop body
LE: loop exit
PB: predicated region body
PF: predicated region fallthrough
CT: control target
= control target key end

     0   :  { %s1698_s0 = inlined_call_operand.vmem [shape: bf16[2,8,32], index: 0, kind: input, shape index: {}]   ;;  %s1699_s1 = inlined_call_operand.vmem [shape: bf16[2,8,32], index: 1, kind: input, shape index: {}]   ;;  %s1700_s2 = inlined_call_operand.vmem [shape: bf16[2,32,16], index: 2, kind: input, shape index: {}]   ;;  %s1701_s3 = inlined_call_operand.vmem [shape: bf16[2,32,8], index: 3, kind: input, shape index: {}]   ;;  %s1702_s4 = inlined_call_operand.vmem [shape: bf16[32,16], index: 4, kind: input, shape index: {}]   ;;  %s1703_s5 = inlined_call_operand.vmem [shape: bf16[32,8], index: 5, kind: input, shape index: {}]   ;;  %s1704_s6 = inlined_call_operand.vmem [shape: bf16[2,16,16], index: 6, kind: input, shape index: {}]   ;;  %s1705_s7 = inlined_call_operand.vmem [shape: bf16[2,16,16], index: 7, kind: input, shape index: {}]   ;;  %s1706_s8 = inlined_call_operand.vmem [shape: f32[8,4], index: 8, kind: input, shape index: {}]   ;;  %s1707_s9 = inlined_call_operand.vmem [shape: f32[8,4], index: 9, kind: input, shape index: {}]   ;;  %s1708_s10 = inlined_call_operand.vmem [shape: f32[8,4], index: 10, kind: input, shape index: {}]   ;;  %s1709_s11 = inlined_call_operand.vmem [shape: f32[8,4], index: 11, kind: input, shape index: {}]   ;;  %s1710_s12 = inlined_call_operand.hbm [shape: f32[2,8,32], index: 12, kind: output, shape index: {}]  }
   0x1   :  { %1716 = sst [smem:[#allocation8_spill]] %s1709_s11 }
   0x2   :  { %17 = vsyncpa [#allocation3], 0 }
   0x3   :  { %19 = vsyncpa [#allocation3 + $0x1], 0  ;;  %s1475_s21 = smov 0   ;;  %s1477_s22 = smov 0  }
   0x4   :  { %s1479_s23 = smov 0   ;;  %s1481_s24 = smov 0  }
   0x5 LB: > { %1717 = sst [smem:[#allocation5_spill]] %s1400_s23  ;;  %s1496_s25 = sadd.s32 4294967295, %s1404_s24   ;;  %s1404_s24 = sphi %s1481_s24, %s1724_s24   ;;  %s1400_s23 = sphi %s1479_s23, %s1726_s23   ;;  %s1396_s22 = sphi %s1477_s22, %s1728_s22   ;;  %s1392_s21 = sphi %s1475_s21, %s1727_s21  }
   0x6   : > { %s1162_s26 = sadd.s32 4294967294, %s1404_s24   ;;  %s1500_s27 = sadd.s32 1, %s1404_s24  }
   0x7   : > { %1718 = sst [smem:[#allocation6_spill]] %s1500_s27  ;;  %s294_s28 = sadd.s32 1, %s1400_s23 }
   0x8   : > { %s291_s29 = ssub.s32 %s1404_s24, %s1500_s27  ;;  %p304_p0 = scmp.ne.s32.totalorder %s1400_s23, %s1396_s22 }
   0x9   : > { %p292_p1 = scmp.eq.s32.totalorder %s291_s29, 0  ;;  %p305_p2 = scmp.eq.s32.totalorder %s1496_s25, 1 }
   0xa   : > { %p310_p3 = scmp.ne.s32.totalorder %s1396_s22, %s1392_s21  ;;  %p311_p4 = scmp.eq.s32.totalorder %s1162_s26, 1 }
   0xb   : > { %s1511_s30 = scalar_select %p292_p1, %s1400_s23, %s294_s28  }
   0xc   : > { %p1513_p5 = por %p305_p2, %p304_p0  ;;  %p1517_p6 = por %p311_p4, %p310_p3 }
   0xd   : > { %1719 = sst [smem:[#allocation7_spill]] %s1511_s30  ;;  %p1165_p7 = scmp.ge.s32.totalorder %s1404_s24, 1 }
   0xe   : > { %p373_p8 = scmp.lt.s32.totalorder %s1404_s24, 3 }
  0x10   : > { %p374_p9 = pnand %p1165_p7, %p373_p8 }
  0x11   : > { %p418_p10 = scmp.lt.s32.totalorder (!%p374_p9), %s1496_s25, 1  ;;  %s1722_s11 = sld [smem:[#allocation8_spill]] (!%p374_p9) }
  0x12   : > { %377 = sbr.rel (%p374_p9) target bundleno = 1852 (0x73c), region = 68  ;;  %s1711_s19 = smov (!%p374_p9), 4  }
  0x13   : > { %s1723_s30 = smov (!%p374_p9), 4   ;;  %s1407_s26 = smov (!%p374_p9), 124  }
  0x14   : > { %s1409_s29 = smov (!%p374_p9), 16  }
  0x17   : > { %v1270_v0 = vld [vmem:[%s1703_s5 + $0x8] sm:$0xff]  ;;  %v492_v1 = vld [vmem:[%s1722_s11] sm:$0xff]  ;;  %s419_s15 = scalar_select %p418_p10, %s1496_s25, 1  ;;  %vm445_vm0 = vcmask 261120   ;;  %vm765_vm1 = vcmask 130048   ;;  %v1280_v48 = vld [vmem:[%s1701_s3 + $0x18] sm:$0xff] }
  0x18   : > { %495 = vrot.lane.b32.xlu0 %v492_v1, %s1711_s19  ;;  %v1274_v2 = vld [vmem:[%s1701_s3 + $0x8] sm:$0xff]  ;;  %484 = vmatpush.bf16.msra.mxu1 %v1270_v0  ;;  %v1269_v3 = vld [vmem:[%s1703_s5] sm:$0xff]  ;;  %v1279_v51 = vld [vmem:[%s1701_s3 + $0x10] sm:$0xff]  ;;  %vm720_vm2 = vcmask 1041408   ;;  %vm817_vm3 = vcmask 1043456   ;;  %vm716_vm4 = vcmask 31744  }
  0x19   : > { %682 = vmatpush.bf16.msra.mxu3 %v1274_v2  ;;  %v1273_v4 = vld [vmem:[%s1701_s3] sm:$0xff]  ;;  %s1167_s17 = sshll.u32 %s419_s15, 2  ;;  %v1268_v8 = vld [vmem:[%s1702_s4 + $0x8] sm:$0xff]  ;;  %vm801_vm6 = vcmask 64512   ;;  %s415_s15 = sand.u32 1, %s1396_s22  }
  0x1a   : > { %s425_s19 = scalar_lea.vmem %s1699_s1, %s1167_s17  ;;  %s421_s20 = scalar_lea.vmem %s1698_s0, %s1167_s17  ;;  %v491_v6 = vld [vmem:[%s1708_s10] sm:$0xff]  ;;  %v1272_v9 = vld [vmem:[%s1700_s2 + $0x8] sm:$0xff]  ;;  %455 = vmatpush.bf16.msra.mxu0 %v1268_v8 }
  0x1b   : > { %v428_v5 = vld [vmem:[%s425_s19] sm:$0xf]  ;;  %653 = vmatpush.bf16.msra.mxu2 %v1272_v9  ;;  %v621_v9 = vlaneseq  ;;  %s1166_s16 = sshll.u32 %s415_s15, 3  ;;  %s1264_s17 = sshll.u32 %s1496_s25, 3 }
  0x1c   : > { %485 = vmatpush.bf16.msra.mxu1 %v1269_v3  ;;  %v1550_v7 = vld [vmem:[%s421_s20] sm:$0xf]  ;;  %s1086_s28 = scalar_lea.hbm %s1710_s12, %s1264_s17  ;;  %s417_s11 = scalar_lea.vmem [#allocation2], %s1166_s16 }
  0x1d   : > { %683 = vmatpush.bf16.msra.mxu3 %v1273_v4  ;;  %v1565_v10 = vld [vmem:[%s1706_s8] sm:$0xff]  ;;  %s1088_s23 = sshll.u32 %s417_s11, 4  ;;  %s1076_s27 = scalar_lea.sflag [#allocation3], %s415_s15  ;;  %s1089_s23 = int_to_ptr.vmem [resolvable:$true] %s1088_s23 }
  0x1e   : > { %v1267_v11 = vld [vmem:[%s1702_s4] sm:$0xff]  ;;  %702 = vrot.lane.b32.xlu2 %v1565_v10, %s1723_s30  ;;  %s1362_s16 = scalar_lea.hbm %s1710_s12, 16 }
  0x1f   : > { %1186 = vmatmul.msk.bf16.vlgmr.msra.gmra.mxu1 %vm445_vm0, %v428_v5  ;;  %v1271_v12 = vld [vmem:[%s1700_s2] sm:$0xff]  ;;  %456 = vmatpush.bf16.msra.mxu0 %v1267_v11  ;;  %v622_v11 = vshrl.u32 %v621_v9, 7 }
  0x20   : > { %538 = vrot.lane.b32.xlu0 %v491_v6, %s1723_s30  ;;  %1204 = vmatmul.msk.bf16.vlgmr.msra.gmra.mxu3 %vm445_vm0, %v1550_v7  ;;  %v1583_v17 = vld [vmem:[%s1707_s9] sm:$0xff] }
  0x21   : > { %654 = vmatpush.bf16.msra.mxu2 %v1271_v12  ;;  %v1275_v32 = vld [vmem:[%s1704_s6] sm:$0xff]  ;;  %v624_v12 = vand.u32 127, %v621_v9 }
  0x22   : > { %1177 = vmatmul.msk.bf16.vlgmr.msra.gmra.mxu0 %vm445_vm0, %v428_v5  ;;  %v1276_v61 = vld [vmem:[%s1705_s7] sm:$0xff] }
  0x23   : > { %vm625_vm5 = vcmp.le.s32.totalorder %v624_v12, %v622_v11 }
  0x24   : > { %1195 = vmatmul.msk.bf16.vlgmr.msra.gmra.mxu2 %vm445_vm0, %v1550_v7 }
  0x25   : > { %776 = vmatpush.bf16.msrb.mxu2 %v1275_v32 }
  0x78   : > { %v1594_v30 = vpop.permute.xlu2 %702 }
  0x8a   : > { %v496_v13 = vpop.permute.xlu0 %495 }
  0x92   : > { %v539_v22 = vpop.permute.xlu0 %538 }
  0x9c   : > { %v487_v14 = vpop.f32.mrf.mxu1 }
  0x9d   : > { %v542_v15 = vmul.f32 %v492_v1, %v487_v14  ;;  %v498_v16 = vmul.f32 %v496_v13, %v487_v14  ;;  %v541_v24 = vmul.f32 %v539_v22, %v487_v14  ;;  %v493_v40 = vmul.f32 %v491_v6, %v487_v14 }
  0x9f   : > { %544 = vrot.lane.b32.xlu1 %v542_v15, %s1723_s30  ;;  %500 = vrot.lane.b32.xlu0 %v498_v16, %s1407_s26  ;;  %v458_v23 = vpop.f32.mrf.mxu0 }
  0xa0   : > { %v585_v57 = vpack.c.bf16 %v458_v23, %v458_v23 }
  0xa2   : > { %v1615_v0 = vsel %vm817_vm3, %v585_v57, 0 }
  0xa3   : > { %v685_v18 = vpop.f32.mrf.mxu3 }
  0xa4   : > { %v489_v19 = vpop.f32.mrf.mxu1  ;;  %v706_v20 = vmul.f32 %v685_v18, %v1583_v17  ;;  %v705_v34 = vmul.f32 %v1594_v30, %v685_v18  ;;  %v689_v53 = vmul.f32 %v685_v18, %v1565_v10 }
  0xa6   : > { %708 = vrot.lane.b32.xlu2 %v706_v20, %s1723_s30 }
  0xa7   : > { %691 = vrot.lane.b32.xlu1 %v1583_v17, %s1723_s30  ;;  %v460_v27 = vpop.f32.mrf.mxu0  ;;  %v656_v31 = vpop.f32.mrf.mxu2 }
  0xa8   : > { %v756_v33 = vpack.c.bf16 %v656_v31, %v656_v31  ;;  %v1277_v27 = vld [vmem:[%s1700_s2 + $0x10] sm:$0xff] }
  0xaa   : > { %1211 = vmatmul.msk.bf16.vlgmr.msrb.gmra.mxu2 %vm765_vm1, %v756_v33 }
  0xab   : > { %v687_v21 = vpop.f32.mrf.mxu3 }
  0xaf   : > { %v658_v36 = vpop.f32.mrf.mxu2 }
 0x100   : > { %v709_v35 = vpop.permute.xlu2 %708 }
 0x101   : > { %v711_v37 = vadd.f32 %v709_v35, %v705_v34 }
 0x103   : > { %v712_v38 = vpack.c.bf16 %v711_v37, %v711_v37 }
 0x105   : > { %714 = vrot.lane.b32.xlu0 %v712_v38, %s1407_s26 }
 0x111   : > { %v545_v25 = vpop.permute.xlu1 %544  ;;  %v501_v39 = vpop.permute.xlu0 %500 }
 0x112   : > { %v547_v26 = vadd.f32 %v545_v25, %v541_v24  ;;  %v503_v41 = vsub.f32 %v493_v40, %v501_v39 }
 0x114   : > { %549 = vrot.lane.b32.xlu1 %v547_v26, %s1407_s26  ;;  %v1278_v26 = vld [vmem:[%s1700_s2 + $0x18] sm:$0xff] }
 0x115   : > { %882 = vmatpush.bf16.msra.mxu2 %v1278_v26 }
 0x119   : > { %v1590_v28 = vpop.permute.xlu1 %691  ;;  %883 = vmatpush.bf16.msra.mxu2 %v1277_v27 }
 0x11a   : > { %v694_v29 = vmul.f32 %v1590_v28, %v685_v18  ;;  %v1408_v18 = vmov -1e+09  }
 0x11b   : > { %v1625_v19 = vsel %vm625_vm5, 0.0, %v1408_v18 }
 0x11c   : > { %696 = vrot.lane.b32.xlu2 %v694_v29, %s1407_s26  ;;  %1231 = vmatmul.msk.bf16.vlgmr.msra.gmra.mxu2 %vm445_vm0, %v1550_v7 }
 0x12d   : > { %v778_v44 = vpop.f32.mrf.mxu2 }
 0x12e   : > { %v782_v50 = vpack.c.bf16 %v778_v44, %v778_v44 }
 0x135   : > { %v780_v45 = vpop.f32.mrf.mxu2 }
 0x149   : > { %586 = vxpose.xlu1.b32.start.end [1/1] (short) (narrow) %v458_v23, 16 }
 0x176   : > { %v697_v52 = vpop.permute.xlu2 %696 }
 0x177   : > { %v699_v58 = vsub.f32 %v689_v53, %v697_v52  ;;  %v715_v2 = vpop.permute.xlu0 %714 }
 0x179   : > { %v700_v1 = vpack.c.bf16 %v699_v58, %v699_v58 }
 0x186   : > { %v550_v42 = vpop.permute.xlu1 %549 }
 0x187   : > { %v1327_v43 = vpack.i.bf16 %v550_v42, %v503_v41 }
 0x189   : > { %1328 = vxpose.xlu2.b32.start.end [1/1] (short) (narrow) %v1327_v43, 8 }
 0x19f   : > { %v885_v37 = vpop.f32.mrf.mxu2 }
 0x1a0   : > { %v970_v38 = vpack.c.bf16 %v885_v37, %v885_v37 }
 0x1a7   : > { %v887_v39 = vpop.f32.mrf.mxu2 }
 0x1ed   : > { %v602_v46 = vpop.trf.xlu1 }
 0x1f5   : > { %v603_v47 = vpop.trf.xlu1 }
 0x1f6   : > { %v618_v49 = vpack.c.bf16 %v603_v47, %v602_v46 }
 0x1f8   : > { %793 = vmatpush.bf16.msrb.mxu3 %v618_v49 }
 0x1fb   : > { %1212 = vmatmul.msk.bf16.vlgmr.msrb.gmra.mxu3 %vm765_vm1, %v782_v50 }
 0x1fc   : > { %912 = vmatpush.bf16.msra.mxu3 %v1280_v48 }
 0x200   : > { %913 = vmatpush.bf16.msra.mxu3 %v1279_v51 }
 0x204   : > { %1007 = vmatpush.bf16.msrb.mxu3 %v618_v49 }
 0x20b   : > { %1244 = vmatmul.msk.bf16.vlgmr.msra.gmra.mxu3 %vm445_vm0, %v1550_v7  ;;  %v1281_v7 = vld [vmem:[%s1704_s6 + $0x8] sm:$0xff] }
 0x20c   : > { %990 = vmatpush.bf16.msrb.mxu2 %v1281_v7 }
 0x20f   : > { %1253 = vmatmul.msk.bf16.vlgmr.msrb.gmra.mxu2 %vm765_vm1, %v970_v38 }
 0x222   : > { %v1329_v54 = vpop.trf.xlu2 }
 0x223   : > { %v1333_v55 = vunpack.i.h.bf16 %v1329_v54  ;;  %v1330_v56 = vunpack.i.l.bf16 %v1329_v54 }
 0x225   : > { %v584_v59 = vpack.c.bf16 %v1333_v55, %v1333_v55  ;;  %v536_v60 = vpack.c.bf16 %v1330_v56, %v1330_v56 }
 0x227   : > { %v722_v62 = vsel %vm720_vm2, %v584_v59, 0  ;;  %v741_v63 = vsel %vm720_vm2, %v536_v60, 0 }
 0x228   : > { %731 = vmatpush.bf16.msrb.mxu0 %v722_v62  ;;  %750 = vmatpush.bf16.msrb.mxu1 %v741_v63 }
 0x22b   : > { %1205 = vmatmul.msk.bf16.vlgmr.msrb.gmra.mxu0 %vm716_vm4, %v715_v2  ;;  %1206 = vmatmul.msk.bf16.vlgmr.msrb.gmra.mxu1 %vm716_vm4, %v700_v1 }
 0x22c   : > { %828 = vmatpush.bf16.msra.mxu0 %v1615_v0  ;;  %853 = vmatpush.bf16.msra.mxu1 %v1276_v61 }
 0x230   : > { %948 = vmatpush.bf16.msrb.mxu0 %v722_v62  ;;  %964 = vmatpush.bf16.msrb.mxu1 %v741_v63 }
 0x27e   : > { %v795_v3 = vpop.f32.mrf.mxu3 }
 0x286   : > { %v797_v4 = vpop.f32.mrf.mxu3 }
 0x28e   : > { %v1620_v5 = vpop.f32.mrf.mxu3 }
 0x28f   : > { %v920_v6 = vmul.f32 %v1620_v5, %v1590_v28  ;;  %v928_v25 = vmul.f32 %v1620_v5, %v1583_v17  ;;  %v927_v33 = vmul.f32 %v1620_v5, %v1594_v30  ;;  %v919_v50 = vmul.f32 %v1620_v5, %v1565_v10 }
 0x291   : > { %922 = vrot.lane.b32.xlu1 %v920_v6, %s1407_s26 }
 0x292   : > { %v992_v44 = vpop.f32.mrf.mxu2 }
 0x293   : > { %v996_v45 = vpack.c.bf16 %v992_v44, %v992_v44 }
 0x295   : > { %1254 = vmatmul.msk.bf16.vlgmr.msrb.gmra.mxu3 %vm765_vm1, %v996_v45 }
 0x296   : > { %v917_v8 = vpop.f32.mrf.mxu3 }
 0x29a   : > { %v994_v46 = vpop.f32.mrf.mxu2 }
 0x2a8   : > { %v733_v13 = vpop.f32.mrf.mxu0  ;;  %v752_v14 = vpop.f32.mrf.mxu1 }
 0x2a9   : > { %v753_v15 = vadd.f32 %v752_v14, %v733_v13  ;;  %v1282_v13 = vld [vmem:[%s1705_s7 + $0x8] sm:$0xff] }
 0x2ab   : > { %v796_v16 = vadd.f32 %v795_v3, %v753_v15 }
 0x2ad   : > { %v799_v20 = vmul.f32 0.20412415, %v796_v16 }
 0x2af   : > { %v800_v21 = vadd.f32 %v799_v20, %v1625_v19 }
 0x2b0   : > { %v735_v22 = vpop.f32.mrf.mxu0  ;;  %v754_v23 = vpop.f32.mrf.mxu1 }
 0x2b1   : > { %v802_v24 = vsel %vm801_vm6, %v800_v21, -inf }
 0x2b2   : > { %803 = vmax.xlane.f32.xlu0 %v802_v24 }
 0x2c6   : > { %930 = vrot.lane.b32.xlu0 %v928_v25, %s1723_s30  ;;  %s1090_s30 = sshll.u32 %s1086_s28, 4  ;;  %s1091_s30 = int_to_ptr.hbm [resolvable:$true] %s1090_s30 }
 0x303   : > { %v923_v51 = vpop.permute.xlu1 %922 }
 0x304   : > { %v925_v52 = vsub.f32 %v919_v50, %v923_v51 }
 0x306   : > { %v926_v54 = vpack.c.bf16 %v925_v52, %v925_v52 }
 0x318   : > { %v1009_v56 = vpop.f32.mrf.mxu3 }
 0x320   : > { %v1011_v57 = vpop.f32.mrf.mxu3 }
 0x325   : > { %v804_v28 = vpop.xlane.xlu0 %803 }
 0x326   : > { %v805_v29 = vsub.f32 %v800_v21, %v804_v28 }
 0x328   : > { %v806_v31 = vmul.f32 1.442695, %v805_v29 }
 0x32a   : > { %1334 = vpow2.f32 %v806_v31 }
 0x330   : > { %v1335_v17 = vpop.eup %1334 }
 0x331   : > { %v808_v32 = vsel %vm801_vm6, %v1335_v17, 0.0 }
 0x332   : > { %809 = vadd.xlane.f32.xlu2 %v808_v32 }
 0x338   : > { %v931_v34 = vpop.permute.xlu0 %930 }
 0x339   : > { %v933_v35 = vadd.f32 %v931_v34, %v927_v33 }
 0x33b   : > { %v934_v36 = vpack.c.bf16 %v933_v35, %v933_v35 }
 0x33d   : > { %936 = vrot.lane.b32.xlu0 %v934_v36, %s1407_s26  ;;  %s1356_s26 = sshra.s32 %s1091_s30, 4  ;;  %s1357_s26 = int_to_ptr.hbm [resolvable:$true] %s1356_s26 }
 0x33e   : > { %s1358_s19 = scalar_lea.hbm %s1357_s26, 8  ;;  %p1363_p0 = scmp.lt.s32.totalorder %s1357_s26, %s1710_s12 }
 0x33f   : > { %p1359_p11 = scmp.ne.s32.totalorder %s1357_s26, %s1358_s19  ;;  %p1364_p1 = scmp.lt.s32.totalorder %s1362_s16, %s1358_s19 }
 0x341   : > { %p1360_p12 = pnand %p1359_p11, %p1513_p5  ;;  %p1365_p2 = por %p1364_p1, %p1363_p0 }
 0x343   : > { %p1361_p13 = pneg %p1360_p12 }
 0x345   : > { %p1366_p3 = pnand %p1365_p2, %p1361_p13 }
 0x3a5   : > { %v810_v40 = vpop.xlane.xlu2 %809 }
 0x3a6   : > { %1336 = vrcp.f32 %v810_v40 }
 0x3ac   : > { %v1337_v41 = vpop.eup %1336 }
 0x3ad   : > { %v812_v42 = vmul.f32 %v1337_v41, %v1335_v17 }
 0x3af   : > { %v813_v30 = vpack.c.bf16 %v812_v42, %v812_v42  ;;  %v937_v43 = vpop.permute.xlu0 %936 }
 0x3b1   : > { %1213 = vmatmul.msk.bf16.vlgmr.msra.gmra.mxu0 %vm801_vm6, %v813_v30 }
 0x3b2   : > { %1037 = vmatpush.bf16.msra.mxu0 %v1615_v0 }
 0x3c1   : > { %1245 = vmatmul.msk.bf16.vlgmr.msrb.gmra.mxu0 %vm716_vm4, %v937_v43 }
 0x42e   : > { %v830_v47 = vpop.f32.mrf.mxu0 }
 0x42f   : > { %v834_v48 = vpack.c.bf16 %v830_v47, %v830_v47 }
 0x431   : > { %1218 = vmatmul.msk.bf16.vlgmr.msra.gmra.mxu1 %vm765_vm1, %v834_v48 }
 0x432   : > { %1063 = vmatpush.bf16.msra.mxu1 %v1282_v13 }
 0x436   : > { %v832_v49 = vpop.f32.mrf.mxu0 }
 0x43e   : > { %v950_v53 = vpop.f32.mrf.mxu0 }
 0x441   : > { %1246 = vmatmul.msk.bf16.vlgmr.msrb.gmra.mxu1 %vm716_vm4, %v926_v54 }
 0x446   : > { %v952_v55 = vpop.f32.mrf.mxu0 }
 0x4ae   : > { %v855_v58 = vpop.f32.mrf.mxu1 }
 0x4b6   : > { %v857_v59 = vpop.f32.mrf.mxu1 }
 0x4be   : > { %v966_v60 = vpop.f32.mrf.mxu1 }
 0x4bf   : > { %v967_v61 = vadd.f32 %v966_v60, %v950_v53 }
 0x4c1   : > { %v1010_v62 = vadd.f32 %v1009_v56, %v967_v61 }
 0x4c3   : > { %v1013_v63 = vmul.f32 0.20412415, %v1010_v62 }
 0x4c5   : > { %v1014_v0 = vadd.f32 %v1013_v63, %v1625_v19 }
 0x4c6   : > { %v968_v1 = vpop.f32.mrf.mxu1 }
 0x4c7   : > { %v1015_v10 = vsel %vm801_vm6, %v1014_v0, -inf }
 0x4c8   : > { %1016 = vmax.xlane.f32.xlu0 %v1015_v10 }
 0x53b   : > { %v1017_v2 = vpop.xlane.xlu0 %1016 }
 0x53c   : > { %v1018_v3 = vsub.f32 %v1014_v0, %v1017_v2 }
 0x53e   : > { %v1019_v4 = vmul.f32 1.442695, %v1018_v3 }
 0x540   : > { %1338 = vpow2.f32 %v1019_v4 }
 0x546   : > { %v1339_v5 = vpop.eup %1338 }
 0x547   : > { %v1021_v6 = vsel %vm801_vm6, %v1339_v5, 0.0 }
 0x548   : > { %1022 = vadd.xlane.f32.xlu0 %v1021_v6 }
 0x5bb   : > { %v1023_v8 = vpop.xlane.xlu0 %1022 }
 0x5bc   : > { %1340 = vrcp.f32 %v1023_v8 }
 0x5c2   : > { %v1341_v9 = vpop.eup %1340 }
 0x5c3   : > { %v1025_v11 = vmul.f32 %v1341_v9, %v1339_v5 }
 0x5c5   : > { %v1026_v12 = vpack.c.bf16 %v1025_v11, %v1025_v11 }
 0x5c7   : > { %1255 = vmatmul.msk.bf16.vlgmr.msra.gmra.mxu0 %vm801_vm6, %v1026_v12 }
 0x644   : > { %v1039_v14 = vpop.f32.mrf.mxu0 }
 0x645   : > { %v1043_v15 = vpack.c.bf16 %v1039_v14, %v1039_v14 }
 0x647   : > { %1262 = vmatmul.msk.bf16.vlgmr.msra.gmra.mxu1 %vm765_vm1, %v1043_v15 }
 0x64c   : > { %v1041_v16 = vpop.f32.mrf.mxu0 }
 0x6c4   : > { %v1065_v18 = vpop.f32.mrf.mxu1 }
 0x6c5   : > { %1070 = vrot.lane.b32.xlu0 %v1065_v18, %s1409_s29 }
 0x6cc   : > { %v1067_v19 = vpop.f32.mrf.mxu1 }
 0x737   : > { %v1071_v20 = vpop.permute.xlu0 %1070 }
 0x738   : > { %v1073_v21 = vsel %vm765_vm1, %v855_v58, %v1071_v20 }
 0x739   : > { %1074 = vst.msk [vmem:[%s417_s11] sm:$0xff] %vm445_vm0, %v1073_v21 }
 0x73a   : > { %1369 = shalt.err (!%p1366_p3)
}
 0x73b   : > { %1283 = dma.vmem_to_hbm [thread:$0]  (%p1513_p5), %s1089_s23, 128, %s1091_s30, %s1076_s27  }
 0x73c PF: > { %p1289_p4 = scmp.ge.s32.totalorder %s1404_s24, 2  ;;  %s1102_s15 = sand.u32 1, %s1392_s21  }
 0x73d   : > { %s1103_s20 = scalar_lea.sflag [#allocation3], %s1102_s15 }
 0x73e   : > { %p1286_p7 = pnand %p1289_p4, %p1517_p6 }
 0x740   : > { %p1287_p8 = pneg %p1286_p7 }
 0x742   : > { %1387 = dma.done.wait (%p1287_p8), %s1103_s20, 128  }
 0x743   : > { %1389 = vsyncadd (%p1287_p8), %s1103_s20, 4294967168  ;;  %s1724_s24 = sld [smem:[#allocation6_spill]]  ;;  %s1727_s21 = smov %s1396_s22 }
 0x744   : > { %s1725_s28 = sld [smem:[#allocation5_spill]] }
 0x745   : > { %s1726_s23 = sld [smem:[#allocation7_spill]] }
 0x749   : > { %p22_p9 = scmp.ge.s32.totalorder %s1724_s24, 4  }
 0x74a   : > { %s1728_s22 = smov %s1725_s28 }
 0x74b   :  { %24 = sbr.rel (!%p22_p9) target bundleno = 5 (0x5), region = 110 }
 0x750   :  { %1109 = vsyncpa [#allocation3], 1 }
 0x751   :  { %1111 = vsyncpa [#allocation3 + $0x1], 1 }

</bundles_post_ra>
